<compile_context>
chip_gen: v7x
topology: tpu7x:2x2x1
jax: 0.10.0
libtpu: 0.0.40
codegen_flags: <defaults>
</compile_context>

<pallas_src>
import functools

import jax
import jax.numpy as jnp
from jax import lax
from jax.experimental import pallas as pl
from jax.experimental.pallas import tpu as pltpu

LANE = 128


def _round_up(x, m):
    return (x + m - 1) // m * m


def _mha_flash_kernel(q_ref, kh_ref, vh_ref,
                      wq_ref, bq_ref, wo_ref, bo_ref,
                      o_ref,
                      qh_s, m_s, l_s, ctx_s, acc_s,
                      *, kv_tile, seq_len_k, mask_kv):
    """One (batch, query-tile, head, kv-tile) grid step.

    q_ref  : (1, tq, d_q)       bf16  raw queries (same block across h, s)
    kh_ref : (1, 1, ts, dh)     bf16  pre-projected keys for this (b, h, kv-tile)
    vh_ref : (1, 1, ts, dh)     bf16  pre-projected values
    wq_ref : (H, d_q, dh)       bf16  resident per-head Q weights (scale folded in)
    bq_ref : (H, 1, dh)         f32   resident per-head Q bias (scaled)
    wo_ref : (H, dh, d_out_p)   bf16  resident per-head output-projection rows
    bo_ref : (1, d_out_p)       f32
    o_ref  : (1, tq, d_out_p)   bf16
    qh_s   : (tq, dh)           bf16  per-head projected queries (computed at s == 0)
    m_s,l_s: (tq, 1)            f32   online-softmax running max / row-sum
    ctx_s  : (tq, dh)           f32   unnormalized p @ V accumulator
    acc_s  : (tq, d_out_p)      f32   output-projection accumulator over heads
    """
    h = pl.program_id(2)
    s = pl.program_id(3)
    n_h = pl.num_programs(2)
    n_s = pl.num_programs(3)

    @pl.when((h == 0) & (s == 0))
    def _init_output_acc():
        acc_s[...] = jnp.zeros_like(acc_s)

    @pl.when(s == 0)
    def _init_head():
        # Per-head Q projection, computed once per (b, t, h); 1/sqrt(dh) already folded.
        qh = jnp.dot(q_ref[0], wq_ref[h], preferred_element_type=jnp.float32)
        qh_s[...] = (qh + bq_ref[h]).astype(qh_s.dtype)
        m_s[...] = jnp.full_like(m_s, -jnp.inf)
        l_s[...] = jnp.zeros_like(l_s)
        ctx_s[...] = jnp.zeros_like(ctx_s)

    # Scores for this kv tile: contract the last dims of q and k (no kh.T materialized).
    sc = lax.dot_general(qh_s[...], kh_ref[0, 0],
                         dimension_numbers=(((1,), (1,)), ((), ())),
                         preferred_element_type=jnp.float32)          # (tq, ts) f32
    if mask_kv:
        col = s * kv_tile + lax.broadcasted_iota(jnp.int32, sc.shape, 1)
        sc = jnp.where(col < seq_len_k, sc, -jnp.inf)

    # Online softmax update (unnormalized accumulation; exact divide at head finalize).
    m_prev = m_s[...]
    m_new = jnp.maximum(m_prev, jnp.max(sc, axis=-1, keepdims=True))
    alpha = jnp.exp(m_prev - m_new)
    p = jnp.exp(sc - m_new)                                           # f32 exp (EUP)
    l_s[...] = alpha * l_s[...] + jnp.sum(p, axis=-1, keepdims=True)
    ctx_s[...] = alpha * ctx_s[...] + jnp.dot(                        # single exp->bf16 cast
        p.astype(jnp.bfloat16), vh_ref[0, 0], preferred_element_type=jnp.float32)
    m_s[...] = m_new

    @pl.when(s == n_s - 1)
    def _finish_head():
        # Deferred, exact softmax normalization on the (tq, dh) context, then fused
        # per-head output projection accumulated over the head axis (no concat).
        ctx = ctx_s[...] / l_s[...]
        acc_s[...] += jnp.dot(ctx.astype(jnp.bfloat16), wo_ref[h],
                              preferred_element_type=jnp.float32)

    @pl.when((h == n_h - 1) & (s == n_s - 1))
    def _store():
        o_ref[0] = (acc_s[...] + bo_ref[...]).astype(o_ref.dtype)


def _prepare_params(params, num_heads):
    """Host-side, one-time parameter transform:
      * fold the 1/sqrt(dh) attention scale into (wq, bq)              (exact)
      * zero-pad d_out up to a multiple of 128 for lane-dense stores   (exact)
      * split Q / output-projection weights per head ((H, d_q, dh) / (H, dh, d_out_p))
      * keep K/V weights unsplit for the hoisted XLA pre-projection
      * cast matmul weights to bf16 (biases stay f32)
    """
    wq, bq, wk, bk, wv, bv, wo, bo = params
    d_q, d_proj = wq.shape
    assert d_proj % num_heads == 0, "d_proj must be divisible by num_heads"
    dh = d_proj // num_heads
    d_out = wo.shape[1]
    scale = dh ** (-0.5)

    wq = wq * scale
    bq = bq * scale

    d_out_p = _round_up(d_out, LANE)
    if d_out_p != d_out:
        wo = jnp.pad(wo, ((0, 0), (0, d_out_p - d_out)))
        bo = jnp.pad(bo, ((0, 0), (0, d_out_p - d_out)))

    wq_h = wq.reshape(d_q, num_heads, dh).transpose(1, 0, 2).astype(jnp.bfloat16)
    bq_h = bq.reshape(num_heads, dh)[:, None, :].astype(jnp.float32)
    wo_h = wo.reshape(num_heads, dh, d_out_p).astype(jnp.bfloat16)
    bo_p = bo.astype(jnp.float32)

    proj_kv = (wk.astype(jnp.bfloat16), bk.astype(jnp.float32),
               wv.astype(jnp.bfloat16), bv.astype(jnp.float32))
    return (wq_h, bq_h, wo_h, bo_p), proj_kv, dh, d_out, d_out_p


def _vmem_limit_bytes():
    # Raise the scoped-VMEM limit toward the chip's physical capacity
    # (128 MiB on v5e/v6e, 64 MiB on v7x), leaving ~25% headroom.
    try:
        cap = int(pltpu.get_tpu_info().vmem_capacity_bytes)
        return (cap * 3) // 4
    except Exception:
        return None


def multi_head_attention(q, k, v, params, *, num_heads, q_tile=256, kv_tile=512):
    B, T, d_q = q.shape
    _, S, d_kv = k.shape

    (wq_h, bq_h, wo_h, bo_p), (wk_bf, bk_f, wv_bf, bv_f), dh, d_out, d_out_p = \
        _prepare_params(params, num_heads)

    q = q.astype(jnp.bfloat16)

    # Hoist the K/V per-head projections out of the query-tile loop: one bf16 XLA matmul
    # each (batched over heads -> full-width MXU), reused by every (b, t, h) grid step.
    def project(x, w_bf, b_f32):
        y = jnp.dot(x.astype(jnp.bfloat16), w_bf,
                    preferred_element_type=jnp.float32) + b_f32       # (B, S, d_proj) f32
        y = y.reshape(x.shape[0], x.shape[1], num_heads, dh)
        return y.transpose(0, 2, 1, 3).astype(jnp.bfloat16)           # (B, H, S, dh) bf16

    kh = project(k, wk_bf, bk_f)
    vh = project(v, wv_bf, bv_f)

    # Query / kv tile sizes: full dim when small (always legal), else a multiple of 8/128.
    tq = min(T, q_tile)
    n_t = pl.cdiv(T, tq)
    ts = min(S, kv_tile)
    n_s = pl.cdiv(S, ts)
    s_pad = n_s * ts
    mask_kv = s_pad != S
    if mask_kv:
        # Zero-pad S so every kv block is in-bounds; padded columns are masked to -inf
        # in-kernel, so they contribute exactly nothing to l or the context.
        pad = s_pad - S
        kh = jnp.pad(kh, ((0, 0), (0, 0), (0, pad), (0, 0)))
        vh = jnp.pad(vh, ((0, 0), (0, 0), (0, pad), (0, 0)))

    H = num_heads
    grid = (B, n_t, H, n_s)   # batch & query tiles parallel (megacore); head/kv arbitrary

    in_specs = [
        pl.BlockSpec((1, tq, d_q), lambda b, t, h, s: (b, t, 0)),
        pl.BlockSpec((1, 1, ts, dh), lambda b, t, h, s: (b, h, s, 0)),
        pl.BlockSpec((1, 1, ts, dh), lambda b, t, h, s: (b, h, s, 0)),
        # VMEM-resident parameter stacks: constant index maps -> fetched once, no
        # per-step weight DMAs; indexed by the head grid id inside the kernel.
        pl.BlockSpec((H, d_q, dh), lambda b, t, h, s: (0, 0, 0)),
        pl.BlockSpec((H, 1, dh), lambda b, t, h, s: (0, 0, 0)),
        pl.BlockSpec((H, dh, d_out_p), lambda b, t, h, s: (0, 0, 0)),
        pl.BlockSpec((1, d_out_p), lambda b, t, h, s: (0, 0)),
    ]

    scratch_shapes = [
        pltpu.VMEM((tq, dh), jnp.bfloat16),       # qh (per-head projected queries)
        pltpu.VMEM((tq, 1), jnp.float32),         # m  (running max)
        pltpu.VMEM((tq, 1), jnp.float32),         # l  (running row-sum)
        pltpu.VMEM((tq, dh), jnp.float32),        # ctx (unnormalized p @ V)
        pltpu.VMEM((tq, d_out_p), jnp.float32),   # output-projection accumulator
    ]

    compiler_kwargs = dict(
        dimension_semantics=("parallel", "parallel", "arbitrary", "arbitrary"))
    vmem_limit = _vmem_limit_bytes()
    if vmem_limit is not None:
        compiler_kwargs["vmem_limit_bytes"] = vmem_limit

    kernel = functools.partial(_mha_flash_kernel,
                               kv_tile=ts, seq_len_k=S, mask_kv=mask_kv)

    out = pl.pallas_call(
        kernel,
        out_shape=jax.ShapeDtypeStruct((B, T, d_out_p), jnp.bfloat16),
        grid_spec=pltpu.PrefetchScalarGridSpec(
            num_scalar_prefetch=0,
            grid=grid,
            in_specs=in_specs,
            out_specs=pl.BlockSpec((1, tq, d_out_p), lambda b, t, h, s: (b, t, 0)),
            scratch_shapes=scratch_shapes,
        ),
        compiler_params=pltpu.CompilerParams(**compiler_kwargs),
    )(q, kh, vh, wq_h, bq_h, wo_h, bo_p)

    # Drop the lane-padding columns (if any) and restore the module's f32 output dtype.
    if d_out_p != d_out:
        out = out[..., :d_out]
    return out.astype(jnp.float32)


def _xavier_uniform(key, fan_in, fan_out, gain=1.0):
    # Matches torch.nn.init.xavier_uniform_ on a (fan_out, fan_in) Linear weight,
    # returned already transposed to (fan_in, fan_out) for x @ W.
    a = gain * (6.0 / (fan_in + fan_out)) ** 0.5
    w = jax.random.uniform(key, (fan_out, fan_in), jnp.float32, minval=-a, maxval=a)
    return w.T


def init_params(key, d_q, d_kv, d_proj, d_out, gain=1.0):
    kq, kk, kv, ko = jax.random.split(key, 4)
    wq = _xavier_uniform(kq, d_q, d_proj)
    wk = _xavier_uniform(kk, d_kv, d_proj)
    wv = _xavier_uniform(kv, d_kv, d_proj)
    wo = _xavier_uniform(ko, d_proj, d_out, gain=gain)
    bq = jnp.zeros((1, d_proj), jnp.float32)
    bk = jnp.zeros((1, d_proj), jnp.float32)
    bv = jnp.zeros((1, d_proj), jnp.float32)
    bo = jnp.zeros((1, d_out), jnp.float32)
    return (wq, bq, wk, bk, wv, bv, wo, bo)


def _reference(q, k, v, params, num_heads):
    wq, bq, wk, bk, wv, bv, wo, bo = params
    B, T, _ = q.shape
    _, S, _ = k.shape
    d_proj = wq.shape[1]
    dh = d_proj // num_heads
    qp = (q @ wq + bq).reshape(B, T, num_heads, dh).transpose(0, 2, 1, 3)
    kp = (k @ wk + bk).reshape(B, S, num_heads, dh).transpose(0, 2, 1, 3)
    vp = (v @ wv + bv).reshape(B, S, num_heads, dh).transpose(0, 2, 1, 3)
    attn = jnp.einsum("bhtd,bhsd->bhts", qp * dh ** -0.5, kp)
    attn = jax.nn.softmax(attn, axis=-1)
    ctx = jnp.einsum("bhts,bhsd->bhtd", attn, vp).transpose(0, 2, 1, 3).reshape(B, T, d_proj)
    return ctx @ wo + bo


if __name__ == "__main__":
    B, T, S = 2, 8, 8
    d_q, d_kv, d_proj, d_out = 32, 32, 32, 32
    num_heads = 4

    key = jax.random.PRNGKey(0)
    kq, kk, kv, kp = jax.random.split(key, 4)
    q = jax.random.normal(kq, (B, T, d_q), jnp.float32)
    k = jax.random.normal(kk, (B, S, d_kv), jnp.float32)
    v = jax.random.normal(kv, (B, S, d_kv), jnp.float32)
    params = init_params(kp, d_q, d_kv, d_proj, d_out)

    out = multi_head_attention(q, k, v, params, num_heads=num_heads)
    out = jax.block_until_ready(out)

    ref = _reference(q, k, v, params, num_heads)
    assert out.shape == (B, T, d_out)
    # bf16 matmul operands + bf16 output -> looser tolerance vs the f32 reference.
    assert jnp.allclose(out, ref, atol=5e-2, rtol=5e-2), "mismatch vs JAX reference"
    print("KERNEL_OK")
</pallas_src>

<mosaic_0001>
module attributes {stable_mosaic.version = 11 : i64} {
  func.func @_mha_flash_kernel(%arg0: i32, %arg1: i32, %arg2: i32, %arg3: i32, %arg4: memref<1x8x32xbf16, #tpu.memory_space<vmem>>, %arg5: memref<1x1x8x8xbf16, #tpu.memory_space<vmem>>, %arg6: memref<1x1x8x8xbf16, #tpu.memory_space<vmem>>, %arg7: memref<4x32x8xbf16, #tpu.memory_space<vmem>>, %arg8: memref<4x1x8xf32, #tpu.memory_space<vmem>>, %arg9: memref<4x8x128xbf16, #tpu.memory_space<vmem>>, %arg10: memref<1x128xf32, #tpu.memory_space<vmem>>, %arg11: memref<1x8x128xbf16, #tpu.memory_space<vmem>>, %arg12: memref<8x8xbf16, #tpu.memory_space<vmem>>, %arg13: memref<8x1xf32, #tpu.memory_space<vmem>>, %arg14: memref<8x1xf32, #tpu.memory_space<vmem>>, %arg15: memref<8x8xf32, #tpu.memory_space<vmem>>, %arg16: memref<8x128xf32, #tpu.memory_space<vmem>>) attributes {dimension_semantics = [#tpu.dimension_semantics<parallel>, #tpu.dimension_semantics<parallel>, #tpu.dimension_semantics<arbitrary>, #tpu.dimension_semantics<arbitrary>], iteration_bounds = array<i64: 2, 1, 4, 1>, scalar_prefetch = 0 : i64, scratch_operands = 5 : i64, tpu.core_type = #tpu.core_type<tc>, window_params = [{transform_indices = @transform_0, window_bounds = array<i64: 1, 8, 32>}, {transform_indices = @transform_1, window_bounds = array<i64: 1, 1, 8, 8>}, {transform_indices = @transform_2, window_bounds = array<i64: 1, 1, 8, 8>}, {pipeline_mode = #tpu.pipeline_mode<synchronous>, transform_indices = @transform_3, window_bounds = array<i64: 4, 32, 8>}, {pipeline_mode = #tpu.pipeline_mode<synchronous>, transform_indices = @transform_4, window_bounds = array<i64: 4, 1, 8>}, {pipeline_mode = #tpu.pipeline_mode<synchronous>, transform_indices = @transform_5, window_bounds = array<i64: 4, 8, 128>}, {pipeline_mode = #tpu.pipeline_mode<synchronous>, transform_indices = @transform_6, window_bounds = array<i64: 1, 128>}, {transform_indices = @transform_7, window_bounds = array<i64: 1, 8, 128>}]} {
    %c0_i32 = arith.constant 0 : i32
    %0 = arith.cmpi eq, %arg2, %c0_i32 : i32
    %c0_i32_0 = arith.constant 0 : i32
    %1 = arith.cmpi eq, %arg3, %c0_i32_0 : i32
    %2 = arith.andi %0, %1 : i1
    %3 = arith.extui %2 : i1 to i32
    %c0_i32_1 = arith.constant 0 : i32
    %4 = arith.cmpi ne, %3, %c0_i32_1 : i32
    scf.if %4 {
      %cst_32 = arith.constant 0.000000e+00 : f32
      %45 = vector.broadcast %cst_32 : f32 to vector<8x128xf32>
      %c0_33 = arith.constant 0 : index
      %c0_34 = arith.constant 0 : index
      %46 = vector.load %arg16[%c0_33, %c0_34] : memref<8x128xf32, #tpu.memory_space<vmem>>, vector<8x128xf32>
      tpu.vector_store %arg16[%c0_33, %c0_34], %45 {strides = array<i32>} : memref<8x128xf32, #tpu.memory_space<vmem>>, vector<8x128xf32>,
    } else {
    }
    %c0_i32_2 = arith.constant 0 : i32
    %5 = arith.cmpi eq, %arg3, %c0_i32_2 : i32
    %6 = arith.extui %5 : i1 to i32
    %c0_i32_3 = arith.constant 0 : i32
    %7 = arith.cmpi ne, %6, %c0_i32_3 : i32
    scf.if %7 {
      %c0_32 = arith.constant 0 : index
      %c0_33 = arith.constant 0 : index
      %c0_34 = arith.constant 0 : index
      %45 = vector.load %arg4[%c0_32, %c0_33, %c0_34] : memref<1x8x32xbf16, #tpu.memory_space<vmem>>, vector<1x8x32xbf16>
      %46 = vector.shape_cast %45 : vector<1x8x32xbf16> to vector<8x32xbf16>
      %47 = arith.index_cast %arg2 : i32 to index
      %c0_35 = arith.constant 0 : index
      %c0_36 = arith.constant 0 : index
      %48 = vector.load %arg7[%47, %c0_35, %c0_36] : memref<4x32x8xbf16, #tpu.memory_space<vmem>>, vector<1x32x8xbf16>
      %49 = vector.shape_cast %48 : vector<1x32x8xbf16> to vector<32x8xbf16>
      %cst_37 = arith.constant dense<0.000000e+00> : vector<8x8xf32>
      %50 = tpu.matmul %46, %49, %cst_37 {dimension_numbers = #tpu.dot_dimension_numbers<[1], [0], [0], [1], [0, 0, 1, 1], [], []>} : vector<8x32xbf16>, vector<32x8xbf16>, vector<8x8xf32> -> vector<8x8xf32>
      %51 = arith.index_cast %arg2 : i32 to index
      %c0_38 = arith.constant 0 : index
      %c0_39 = arith.constant 0 : index
      %52 = vector.load %arg8[%51, %c0_38, %c0_39] : memref<4x1x8xf32, #tpu.memory_space<vmem>>, vector<1x1x8xf32>
      %53 = vector.shape_cast %52 : vector<1x1x8xf32> to vector<1x8xf32>
      %54 = vector.broadcast %53 : vector<1x8xf32> to vector<8x8xf32>
      %55 = arith.addf %50, %54 : vector<8x8xf32>
      %56 = arith.truncf %55 : vector<8x8xf32> to vector<8x8xbf16>
      %c0_40 = arith.constant 0 : index
      %c0_41 = arith.constant 0 : index
      %57 = vector.load %arg12[%c0_40, %c0_41] : memref<8x8xbf16, #tpu.memory_space<vmem>>, vector<8x8xbf16>
      tpu.vector_store %arg12[%c0_40, %c0_41], %56 {strides = array<i32>} : memref<8x8xbf16, #tpu.memory_space<vmem>>, vector<8x8xbf16>,
      %cst_42 = arith.constant 0xFF800000 : f32
      %58 = vector.broadcast %cst_42 : f32 to vector<8x1xf32>
      %c0_43 = arith.constant 0 : index
      %c0_44 = arith.constant 0 : index
      %59 = vector.load %arg13[%c0_43, %c0_44] : memref<8x1xf32, #tpu.memory_space<vmem>>, vector<8x1xf32>
      tpu.vector_store %arg13[%c0_43, %c0_44], %58 {strides = array<i32>} : memref<8x1xf32, #tpu.memory_space<vmem>>, vector<8x1xf32>,
      %cst_45 = arith.constant 0.000000e+00 : f32
      %60 = vector.broadcast %cst_45 : f32 to vector<8x1xf32>
      %c0_46 = arith.constant 0 : index
      %c0_47 = arith.constant 0 : index
      %61 = vector.load %arg14[%c0_46, %c0_47] : memref<8x1xf32, #tpu.memory_space<vmem>>, vector<8x1xf32>
      tpu.vector_store %arg14[%c0_46, %c0_47], %60 {strides = array<i32>} : memref<8x1xf32, #tpu.memory_space<vmem>>, vector<8x1xf32>,
      %cst_48 = arith.constant 0.000000e+00 : f32
      %62 = vector.broadcast %cst_48 : f32 to vector<8x8xf32>
      %c0_49 = arith.constant 0 : index
      %c0_50 = arith.constant 0 : index
      %63 = vector.load %arg15[%c0_49, %c0_50] : memref<8x8xf32, #tpu.memory_space<vmem>>, vector<8x8xf32>
      tpu.vector_store %arg15[%c0_49, %c0_50], %62 {strides = array<i32>} : memref<8x8xf32, #tpu.memory_space<vmem>>, vector<8x8xf32>,
    } else {
    }
    %c0 = arith.constant 0 : index
    %c0_4 = arith.constant 0 : index
    %8 = vector.load %arg12[%c0, %c0_4] : memref<8x8xbf16, #tpu.memory_space<vmem>>, vector<8x8xbf16>
    %c0_5 = arith.constant 0 : index
    %c0_6 = arith.constant 0 : index
    %c0_7 = arith.constant 0 : index
    %c0_8 = arith.constant 0 : index
    %9 = vector.load %arg5[%c0_5, %c0_6, %c0_7, %c0_8] : memref<1x1x8x8xbf16, #tpu.memory_space<vmem>>, vector<1x1x8x8xbf16>
    %10 = vector.shape_cast %9 : vector<1x1x8x8xbf16> to vector<8x8xbf16>
    %cst = arith.constant dense<0.000000e+00> : vector<8x8xf32>
    %11 = tpu.matmul %8, %10, %cst {dimension_numbers = #tpu.dot_dimension_numbers<[1], [1], [0], [0], [0, 0, 1, 0], [], []>} : vector<8x8xbf16>, vector<8x8xbf16>, vector<8x8xf32> -> vector<8x8xf32>
    %c0_9 = arith.constant 0 : index
    %c0_10 = arith.constant 0 : index
    %12 = vector.load %arg13[%c0_9, %c0_10] : memref<8x1xf32, #tpu.memory_space<vmem>>, vector<8x1xf32>
    %cst_11 = arith.constant dense<0xFF800000> : vector<8xf32>
    %13 = vector.multi_reduction <maximumf>, %11, %cst_11 [1] : vector<8x8xf32> to vector<8xf32>
    %14 = vector.shape_cast %13 : vector<8xf32> to vector<8x1xf32>
    %15 = arith.maximumf %12, %14 : vector<8x1xf32>
    %16 = arith.subf %12, %15 : vector<8x1xf32>
    %17 = math.exp %16 : vector<8x1xf32>
    %18 = vector.broadcast %15 : vector<8x1xf32> to vector<8x8xf32>
    %19 = arith.subf %11, %18 : vector<8x8xf32>
    %20 = math.exp %19 : vector<8x8xf32>
    %c0_12 = arith.constant 0 : index
    %c0_13 = arith.constant 0 : index
    %21 = vector.load %arg14[%c0_12, %c0_13] : memref<8x1xf32, #tpu.memory_space<vmem>>, vector<8x1xf32>
    %22 = arith.mulf %17, %21 : vector<8x1xf32>
    %cst_14 = arith.constant dense<0.000000e+00> : vector<8xf32>
    %23 = vector.multi_reduction <add>, %20, %cst_14 [1] : vector<8x8xf32> to vector<8xf32>
    %24 = vector.shape_cast %23 : vector<8xf32> to vector<8x1xf32>
    %25 = arith.addf %22, %24 : vector<8x1xf32>
    %c0_15 = arith.constant 0 : index
    %c0_16 = arith.constant 0 : index
    %26 = vector.load %arg14[%c0_15, %c0_16] : memref<8x1xf32, #tpu.memory_space<vmem>>, vector<8x1xf32>
    tpu.vector_store %arg14[%c0_15, %c0_16], %25 {strides = array<i32>} : memref<8x1xf32, #tpu.memory_space<vmem>>, vector<8x1xf32>,
    %c0_17 = arith.constant 0 : index
    %c0_18 = arith.constant 0 : index
    %27 = vector.load %arg15[%c0_17, %c0_18] : memref<8x8xf32, #tpu.memory_space<vmem>>, vector<8x8xf32>
    %28 = vector.broadcast %17 : vector<8x1xf32> to vector<8x8xf32>
    %29 = arith.mulf %28, %27 : vector<8x8xf32>
    %30 = arith.truncf %20 : vector<8x8xf32> to vector<8x8xbf16>
    %c0_19 = arith.constant 0 : index
    %c0_20 = arith.constant 0 : index
    %c0_21 = arith.constant 0 : index
    %c0_22 = arith.constant 0 : index
    %31 = vector.load %arg6[%c0_19, %c0_20, %c0_21, %c0_22] : memref<1x1x8x8xbf16, #tpu.memory_space<vmem>>, vector<1x1x8x8xbf16>
    %32 = vector.shape_cast %31 : vector<1x1x8x8xbf16> to vector<8x8xbf16>
    %cst_23 = arith.constant dense<0.000000e+00> : vector<8x8xf32>
    %33 = tpu.matmul %30, %32, %cst_23 {dimension_numbers = #tpu.dot_dimension_numbers<[1], [0], [0], [1], [0, 0, 1, 1], [], []>} : vector<8x8xbf16>, vector<8x8xbf16>, vector<8x8xf32> -> vector<8x8xf32>
    %34 = arith.addf %29, %33 : vector<8x8xf32>
    %c0_24 = arith.constant 0 : index
    %c0_25 = arith.constant 0 : index
    %35 = vector.load %arg15[%c0_24, %c0_25] : memref<8x8xf32, #tpu.memory_space<vmem>>, vector<8x8xf32>
    tpu.vector_store %arg15[%c0_24, %c0_25], %34 {strides = array<i32>} : memref<8x8xf32, #tpu.memory_space<vmem>>, vector<8x8xf32>,
    %c0_26 = arith.constant 0 : index
    %c0_27 = arith.constant 0 : index
    %36 = vector.load %arg13[%c0_26, %c0_27] : memref<8x1xf32, #tpu.memory_space<vmem>>, vector<8x1xf32>
    tpu.vector_store %arg13[%c0_26, %c0_27], %15 {strides = array<i32>} : memref<8x1xf32, #tpu.memory_space<vmem>>, vector<8x1xf32>,
    %c0_i32_28 = arith.constant 0 : i32
    %37 = arith.cmpi eq, %arg3, %c0_i32_28 : i32
    %38 = arith.extui %37 : i1 to i32
    %c0_i32_29 = arith.constant 0 : i32
    %39 = arith.cmpi ne, %38, %c0_i32_29 : i32
    scf.if %39 {
      %c0_32 = arith.constant 0 : index
      %c0_33 = arith.constant 0 : index
      %45 = vector.load %arg15[%c0_32, %c0_33] : memref<8x8xf32, #tpu.memory_space<vmem>>, vector<8x8xf32>
      %c0_34 = arith.constant 0 : index
      %c0_35 = arith.constant 0 : index
      %46 = vector.load %arg14[%c0_34, %c0_35] : memref<8x1xf32, #tpu.memory_space<vmem>>, vector<8x1xf32>
      %47 = vector.broadcast %46 : vector<8x1xf32> to vector<8x8xf32>
      %48 = arith.divf %45, %47 : vector<8x8xf32>
      %c0_36 = arith.constant 0 : index
      %c0_37 = arith.constant 0 : index
      %49 = vector.load %arg16[%c0_36, %c0_37] : memref<8x128xf32, #tpu.memory_space<vmem>>, vector<8x128xf32>
      %50 = arith.truncf %48 : vector<8x8xf32> to vector<8x8xbf16>
      %51 = arith.index_cast %arg2 : i32 to index
      %c0_38 = arith.constant 0 : index
      %c0_39 = arith.constant 0 : index
      %52 = vector.load %arg9[%51, %c0_38, %c0_39] : memref<4x8x128xbf16, #tpu.memory_space<vmem>>, vector<1x8x128xbf16>
      %53 = vector.shape_cast %52 : vector<1x8x128xbf16> to vector<8x128xbf16>
      %cst_40 = arith.constant dense<0.000000e+00> : vector<8x128xf32>
      %54 = tpu.matmul %50, %53, %cst_40 {dimension_numbers = #tpu.dot_dimension_numbers<[1], [0], [0], [1], [0, 0, 1, 1], [], []>} : vector<8x8xbf16>, vector<8x128xbf16>, vector<8x128xf32> -> vector<8x128xf32>
      %55 = arith.addf %49, %54 : vector<8x128xf32>
      %c0_41 = arith.constant 0 : index
      %c0_42 = arith.constant 0 : index
      %56 = vector.load %arg16[%c0_41, %c0_42] : memref<8x128xf32, #tpu.memory_space<vmem>>, vector<8x128xf32>
      tpu.vector_store %arg16[%c0_41, %c0_42], %55 {strides = array<i32>} : memref<8x128xf32, #tpu.memory_space<vmem>>, vector<8x128xf32>,
    } else {
    }
    %c3_i32 = arith.constant 3 : i32
    %40 = arith.cmpi eq, %arg2, %c3_i32 : i32
    %c0_i32_30 = arith.constant 0 : i32
    %41 = arith.cmpi eq, %arg3, %c0_i32_30 : i32
    %42 = arith.andi %40, %41 : i1
    %43 = arith.extui %42 : i1 to i32
    %c0_i32_31 = arith.constant 0 : i32
    %44 = arith.cmpi ne, %43, %c0_i32_31 : i32
    scf.if %44 {
      %c0_32 = arith.constant 0 : index
      %c0_33 = arith.constant 0 : index
      %45 = vector.load %arg16[%c0_32, %c0_33] : memref<8x128xf32, #tpu.memory_space<vmem>>, vector<8x128xf32>
      %c0_34 = arith.constant 0 : index
      %c0_35 = arith.constant 0 : index
      %46 = vector.load %arg10[%c0_34, %c0_35] : memref<1x128xf32, #tpu.memory_space<vmem>>, vector<1x128xf32>
      %47 = vector.broadcast %46 : vector<1x128xf32> to vector<8x128xf32>
      %48 = arith.addf %45, %47 : vector<8x128xf32>
      %49 = arith.truncf %48 : vector<8x128xf32> to vector<8x128xbf16>
      %c0_36 = arith.constant 0 : index
      %c0_37 = arith.constant 0 : index
      %c0_38 = arith.constant 0 : index
      %50 = vector.load %arg11[%c0_36, %c0_37, %c0_38] : memref<1x8x128xbf16, #tpu.memory_space<vmem>>, vector<1x8x128xbf16>
      %51 = vector.shape_cast %50 : vector<1x8x128xbf16> to vector<8x128xbf16>
      %52 = vector.shape_cast %49 : vector<8x128xbf16> to vector<1x8x128xbf16>
      tpu.vector_store %arg11[%c0_36, %c0_37, %c0_38], %52 {strides = array<i32>} : memref<1x8x128xbf16, #tpu.memory_space<vmem>>, vector<1x8x128xbf16>,
    } else {
    }
    return
  }
  func.func @transform_0(%arg0: i32, %arg1: i32, %arg2: i32, %arg3: i32) -> (i32, i32, i32) {
    %c0_i32 = arith.constant 0 : i32
    %c0_i32_0 = arith.constant 0 : i32
    return %arg0, %arg1, %c0_i32 : i32, i32, i32
  }
  func.func @transform_1(%arg0: i32, %arg1: i32, %arg2: i32, %arg3: i32) -> (i32, i32, i32, i32) {
    %c0_i32 = arith.constant 0 : i32
    %c0_i32_0 = arith.constant 0 : i32
    return %arg0, %arg2, %arg3, %c0_i32 : i32, i32, i32, i32
  }
  func.func @transform_2(%arg0: i32, %arg1: i32, %arg2: i32, %arg3: i32) -> (i32, i32, i32, i32) {
    %c0_i32 = arith.constant 0 : i32
    %c0_i32_0 = arith.constant 0 : i32
    return %arg0, %arg2, %arg3, %c0_i32 : i32, i32, i32, i32
  }
  func.func @transform_3(%arg0: i32, %arg1: i32, %arg2: i32, %arg3: i32) -> (i32, i32, i32) {
    %c0_i32 = arith.constant 0 : i32
    %c0_i32_0 = arith.constant 0 : i32
    %c0_i32_1 = arith.constant 0 : i32
    %c0_i32_2 = arith.constant 0 : i32
    return %c0_i32, %c0_i32_0, %c0_i32_1 : i32, i32, i32
  }
  func.func @transform_4(%arg0: i32, %arg1: i32, %arg2: i32, %arg3: i32) -> (i32, i32, i32) {
    %c0_i32 = arith.constant 0 : i32
    %c0_i32_0 = arith.constant 0 : i32
    %c0_i32_1 = arith.constant 0 : i32
    %c0_i32_2 = arith.constant 0 : i32
    return %c0_i32, %c0_i32_0, %c0_i32_1 : i32, i32, i32
  }
  func.func @transform_5(%arg0: i32, %arg1: i32, %arg2: i32, %arg3: i32) -> (i32, i32, i32) {
    %c0_i32 = arith.constant 0 : i32
    %c0_i32_0 = arith.constant 0 : i32
    %c0_i32_1 = arith.constant 0 : i32
    %c0_i32_2 = arith.constant 0 : i32
    return %c0_i32, %c0_i32_0, %c0_i32_1 : i32, i32, i32
  }
  func.func @transform_6(%arg0: i32, %arg1: i32, %arg2: i32, %arg3: i32) -> (i32, i32) {
    %c0_i32 = arith.constant 0 : i32
    %c0_i32_0 = arith.constant 0 : i32
    %c0_i32_1 = arith.constant 0 : i32
    return %c0_i32, %c0_i32_0 : i32, i32
  }
  func.func @transform_7(%arg0: i32, %arg1: i32, %arg2: i32, %arg3: i32) -> (i32, i32, i32) {
    %c0_i32 = arith.constant 0 : i32
    %c0_i32_0 = arith.constant 0 : i32
    return %arg0, %arg1, %c0_i32 : i32, i32, i32
  }
}

</mosaic_0001>

<bundles_post_ra>
// kernel: tpu_custom_call.1
= control target key start
LH: loop header
LB: loop body
LE: loop exit
PB: predicated region body
PF: predicated region fallthrough
CT: control target
= control target key end

     0   :  { %s1441_s0 = inlined_call_operand.hbm [shape: bf16[2,8,32], index: 0, kind: input, shape index: {}]   ;;  %s1442_s1 = inlined_call_operand.vmem [shape: bf16[2,4,8,8], index: 1, kind: input, shape index: {}]   ;;  %s1443_s2 = inlined_call_operand.vmem [shape: bf16[2,4,8,8], index: 2, kind: input, shape index: {}]   ;;  %s1444_s3 = inlined_call_operand.vmem [shape: bf16[4,32,8], index: 3, kind: input, shape index: {}]   ;;  %s1445_s4 = inlined_call_operand.vmem [shape: f32[4,1,8], index: 4, kind: input, shape index: {}]   ;;  %s1446_s5 = inlined_call_operand.vmem [shape: bf16[4,8,128], index: 5, kind: input, shape index: {}]   ;;  %s1447_s6 = inlined_call_operand.vmem [shape: f32[1,128], index: 6, kind: input, shape index: {}]   ;;  %s1448_s7 = inlined_call_operand.hbm [shape: bf16[2,8,128], index: 7, kind: output, shape index: {}]  }
   0x1   :  { %1453 = sst [smem:[#allocation17_spill]] %s1441_s0 }
   0x2   :  { %12 = vsyncpa [#allocation8], 0 }
   0x3   :  { %14 = vsyncpa [#allocation8 + $0x1], 0 }
   0x4   :  { %15 = vsyncpa [#allocation9], 0 }
   0x5   :  { %17 = vsyncpa [#allocation9 + $0x1], 0  ;;  %s1202_s24 = smov 0   ;;  %s1204_s25 = smov 0  }
   0x6   :  { %s1206_s26 = smov 0   ;;  %s1208_s27 = smov 0  }
   0x7   :  { %s1210_s28 = smov 0   ;;  %s1212_s29 = smov 0  }
   0x8   :  { %s1214_s30 = smov 0   ;;  %s1216_s8 = smov 0  }
   0x9 LB: > { %1454 = sst [smem:[#allocation13_spill]] %s1145_s29  ;;  %s864_s9 = sadd.s32 4294967295, %s1153_s8   ;;  %s1153_s8 = sphi %s1216_s8, %s23_s8   ;;  %s1149_s30 = sphi %s1214_s30, %s1471_s30   ;;  %s1145_s29 = sphi %s1212_s29, %s1470_s29   ;;  %s1141_s28 = sphi %s1210_s28, %s1469_s28   ;;  %s1137_s27 = sphi %s1208_s27, %s1468_s27   ;;  %s1133_s26 = sphi %s1206_s26, %s1474_s26   ;;  %s1129_s25 = sphi %s1204_s25, %s1473_s25   ;;  %s1125_s24 = sphi %s1202_s24, %s1472_s24  }
   0xa   : > { %1455 = sst [smem:[#allocation14_spill]] %s1149_s30  ;;  %s865_s10 = sadd.s32 4294967294, %s1153_s8  }
   0xb   : > { %s41_s11 = sadd.s32 1, %s1145_s29  ;;  %s49_s12 = sadd.s32 1, %s1149_s30 }
   0xc   : > { %p43_p0 = scmp.ge.s32.totalorder %s41_s11, 4  ;;  %s58_s13 = sadd.s32 1, %s1133_s26 }
   0xd   : > { %p65_p1 = scmp.ne.s32.totalorder %s1133_s26, %s1129_s25  ;;  %p66_p2 = scmp.eq.s32.totalorder %s1153_s8, 0 }
   0xe   : > { %s1476_s11 = smov (%p43_p0, %s41_s11), 0  ;;  %s1478_s12 = smov (!%p43_p0, %s49_s12), %s1149_s30 }
   0xf   : > { %1456 = sst [smem:[#allocation15_spill]] %s1476_s11  ;;  %p1253_p3 = por %p66_p2, %p65_p1 }
  0x10   : > { %p71_p4 = scmp.ne.s32.totalorder %s1129_s25, %s1125_s24  ;;  %p51_p5 = scmp.ge.s32.totalorder %s1478_s12, 2 }
  0x11   : > { %p72_p6 = scmp.eq.s32.totalorder %s864_s9, 0  ;;  %p241_p7 = scmp.eq.s32.totalorder %s864_s9, 7 }
  0x12   : > { %p247_p8 = scmp.eq.s32.totalorder %s865_s10, 7  ;;  %s1480_s12 = smov (%p51_p5, %s1478_s12), 0 }
  0x13   : > { %1458 = sst [smem:[#allocation16_spill]] %s1480_s12  ;;  %p1261_p9 = por %p72_p6, %p71_p4 }
  0x14   : > { %p1265_p10 = por %p241_p7, %p65_p1  ;;  %s53_s17 = ssub.s32 %s1149_s30, %s1480_s12 }
  0x15   : > { %p1271_p11 = por %p247_p8, %p71_p4  ;;  %p56_p12 = scmp.eq.s32.totalorder %s53_s17, 0 }
  0x16   : > { %s1460_s16 = scalar_select %p1265_p10, 1, 0 }
  0x17   : > { %s1461_s18 = scalar_select %p1271_p11, 1, 0 }
  0x18   : > { %p944_p13 = scmp.lt.s32.totalorder %s1153_s8, 8  ;;  %s279_s19 = sand.u32 1, %s1133_s26  }
  0x19   : > { %s1278_s20 = scalar_select %p56_p12, %s1133_s26, %s58_s13  }
  0x1a   : > { %s868_s21 = sshll.u32 %s279_s19, 2  ;;  %s869_s22 = sshll.u32 %s1149_s30, 6 }
  0x1b   : > { %s1462_s0 = sld [smem:[#allocation17_spill]]  ;;  %s283_s12 = scalar_lea.vmem [#allocation7], %s868_s21 }
  0x1c   : > { %s291_s11 = sshll.u32 %s283_s12, 4  ;;  %p1290_p0 = pnand %p944_p13, %p1253_p3  ;;  %s1286_s11 = int_to_ptr.vmem [resolvable:$true] %s291_s11 }
  0x1d   : > { %s280_s13 = scalar_lea.sflag [#allocation8], %s279_s19 }
  0x1e   : > { %p1027_p5 = pneg %p1290_p0 }
  0x21   : > { %s1284_s10 = scalar_lea.hbm %s1462_s0, %s869_s22  ;;  %s1030_s14 = scalar_lea.hbm %s1462_s0, 128 }
  0x22   : > { %s1025_s22 = scalar_lea.hbm %s1284_s10, 64  ;;  %p1031_p3 = scmp.lt.u32.totalorder %s1284_s10, %s1462_s0 }
  0x23   : > { %p1026_p4 = scmp.ne.s32.totalorder %s1284_s10, %s1025_s22  ;;  %p1032_p8 = scmp.lt.u32.totalorder %s1030_s14, %s1025_s22 }
  0x24   : > { %p1034_p13 = scmp.lt.u32.totalorder %s1025_s22, %s1284_s10 }
  0x25   : > { %p1028_p6 = pnand %p1027_p5, %p1026_p4  ;;  %p1033_p12 = por %p1032_p8, %p1031_p3 }
  0x27   : > { %p1029_p7 = pneg %p1028_p6  ;;  %p1035_p1 = por %p1034_p13, %p1033_p12 }
  0x29   : > { %p1036_p2 = pnand %p1035_p1, %p1029_p7 }
  0x2b   : > { %1039 = shalt.err (!%p1036_p2)
}
  0x2c   : > { %s1040_s19 = scalar_lea.vmem %s1286_s11, 64  ;;  %s1155_s12 = smov [#allocation7]  }
  0x2d   : > { %p1041_p4 = scmp.ne.s32.totalorder %s1286_s11, %s1040_s19  ;;  %s1045_s21 = sshll.u32 %s1155_s12, 4  ;;  %s1046_s21 = int_to_ptr.vmem [resolvable:$false] %s1045_s21 }
  0x2e   : > { %s1047_s23 = scalar_lea.vmem %s1046_s21, 128  ;;  %p1048_p10 = scmp.lt.s32.totalorder %s1286_s11, %s1046_s21 }
  0x2f   : > { %p1043_p6 = pnand %p1041_p4, %p1027_p5  ;;  %p1049_p3 = scmp.lt.s32.totalorder %s1047_s23, %s1040_s19 }
  0x31   : > { %p1044_p11 = pneg %p1043_p6  ;;  %p1050_p8 = por %p1049_p3, %p1048_p10 }
  0x33   : > { %p1051_p12 = pnand %p1050_p8, %p1044_p11 }
  0x35   : > { %1054 = shalt.err (!%p1051_p12)
}
  0x36   : > { %939 = dma.hbm_to_vmem [thread:$0]  (!%p1290_p0), %s1284_s10, 64, %s1286_s11, %s280_s13  }
  0x37   : > { %p1464_p1 = scmp.lt.s32.totalorder %s1153_s8, 9  ;;  %p1465_p2 = scmp.ge.s32.totalorder %s1153_s8, 1 }
  0x39   : > { %p325_p5 = pnand %p1465_p2, %p1464_p1 }
  0x3a   : > { %s1326_s22 = sand.u32 (!%p325_p5), 1, %s1129_s25  }
  0x3b   : > { %328 = sbr.rel (%p325_p5) target bundleno = 1360 (0x550), region = 48  ;;  %s871_s14 = sshll.u32 (!%p325_p5), %s1326_s22, 2 }
  0x3c   : > { %s331_s9 = scalar_lea.sflag (!%p325_p5), [#allocation8], %s1326_s22  ;;  %s1330_s19 = scalar_lea.vmem (!%p325_p5), [#allocation7], %s871_s14 }
  0x42   : > { %1116 = dma.done.wait (%p1261_p9), %s331_s9, 64  }
  0x43   : > { %1118 = vsyncadd (%p1261_p9), %s331_s9, 4294967232  ;;  %p387_p10 = scmp.lt.s32.totalorder %s1141_s28, 1  ;;  %p389_p11 = scmp.lt.s32.totalorder %s1137_s27, 3 }
  0x44   : > { %p410_p0 = scmp.eq.s32.totalorder %s1137_s27, 0  ;;  %s1349_s29 = scalar_lea.vmem [#allocation10], %s871_s14 }
  0x45   : > { %s388_s11 = scalar_select %p387_p10, %s1141_s28, 1 }
  0x46   : > { %s390_s10 = scalar_select %p389_p11, %s1137_s27, 3 }
  0x47   : > { %s873_s17 = sshll.u32 %s388_s11, 2  ;;  %415 = sbr.rel (!%p410_p0) target bundleno = 78 (0x4e), region = 56  ;;  %v1156_v0 = vmov (%p410_p0), 0.0  }
  0x48   : > { %s395_s13 = sadd.s32 %s873_s17, %s390_s10  ;;  %416 = vst [vmem:[#allocation6] sm:$0xff] (%p410_p0), %v1156_v0 }
  0x49   : > { %s874_s12 = sshll.u32 %s395_s13, 2 }
  0x4a   : > { %s397_s0 = scalar_lea.vmem %s1442_s1, %s874_s12  ;;  %s1347_s9 = scalar_lea.vmem %s1443_s2, %s874_s12 }
  0x4e PF: > { %s895_s11 = sshll.u32 %s1137_s27, 4  ;;  %v1157_v1 = vmov 0.0   ;;  %vm1158_vm0 = vmmov 0   ;;  %v420_v4 = vld [vmem:[%s1330_s19] sm:$0xf]  ;;  %vm448_vm1 = vcmask 261120   ;;  %s428_s12 = scalar_lea.vmem %s1445_s4, %s1137_s27 }
  0x4f   : > { %906 = vmatprep.subr.bf16.mxu0 %v1157_v1  ;;  %s423_s13 = scalar_lea.vmem %s1444_s3, %s895_s11  ;;  %910 = vmatprep.mubr.msk.bf16.mxu0 %vm1158_vm0, %v1157_v1  ;;  %vm498_vm2 = vcmask 64512   ;;  %v501_v5 = vld [vmem:[%s397_s0] sm:$0xf]  ;;  %vm493_vm3 = vcmask 60416   ;;  %vm495_vm4 = vcmask 7168   ;;  %v1159_v15 = vmov -inf  }
  0x50   : > { %v1017_v2 = vld [vmem:[%s423_s13] sm:$0xff]   ;;  %914 = vmatprep.subr.bf16.mxu1 %v1157_v1  ;;  %916 = vmatprep.mubr.msk.bf16.mxu1 %vm1158_vm0, %v1157_v1  ;;  %v1018_v3 = vld [vmem:[%s423_s13 + $0x8] sm:$0xff]   ;;  %499 = vst.msk [vmem:[#allocation5] sm:$0xff] %vm498_vm2, %v1157_v1  ;;  %v507_v6 = vsel %vm498_vm2, %v501_v5, 0  ;;  %v1160_v21 = vmov 0   ;;  %vm585_vm5 = vcmask 1043456  }
  0x51   : > { %907 = vmatpush3.bf16.msra.mxu0 %v1017_v2  ;;  %915 = vmatpush3.bf16.xpose.msra.mxu1 %v507_v6  ;;  %v880_v7 = vld [vmem:[%s428_s12] ss:$0 sm:$0xff]  ;;  %496 = vst.msk [vmem:[#allocation3] sm:$0xff] %vm495_vm4, %v1159_v15  ;;  %497 = vst.msk [vmem:[#allocation4] sm:$0xff] %vm495_vm4, %v1157_v1  ;;  %s886_s0 = sshll.u32 %s1137_s27, 2  ;;  %p697_p9 = scmp.eq.s32.totalorder %s1137_s27, 3 }
  0x52   : > { %908 = vmatprep.subr.bf16.mxu0 %v1157_v1  ;;  %926 = vmatprep.subr.bf16.mxu1 %v1157_v1  ;;  %v581_v26 = vld [vmem:[%s1347_s9] sm:$0xf]  ;;  %s647_s23 = scalar_lea.vmem %s1446_s5, %s886_s0 }
  0x53   : > { %1015 = vset.pattern.permute.xlu0 %v1160_v21  ;;  %1016 = vset.pattern.permute.xlu1 %v1160_v21  ;;  %v587_v27 = vsel %vm585_vm5, %v581_v26, 0  ;;  %v648_v41 = vld [vmem:[%s647_s23] sm:$0xf] }
  0x54   : > { %v653_v42 = vsel %vm585_vm5, %v648_v41, 0  ;;  %v644_v56 = vld [vmem:[#allocation6] sm:$0xff] }
  0x55   : > { %909 = vmatpush3.bf16.msra.mxu0 %v1018_v3  ;;  %v889_v63 = vld [vmem:[%s1447_s6] ss:$0 sm:$0xff] (%p697_p9) }
  0x56   : > { %920 = vmatprep.subr.bf16.mxu0 %v1157_v1 }
  0x57   : > { %v573_v43 = vld [vmem:[#allocation5] sm:$0xff] }
  0x58   : > { %911 = vmatmul.mubr.msk.bf16.vlgmr.msra.gmra.mrb[0].mxu0 %vm448_vm1, %v420_v4  ;;  %v549_v22 = vld [vmem:[#allocation3] sm:$0xff]  ;;  %v565_v36 = vld [vmem:[#allocation4] sm:$0xff] }
  0x59   : > { %922 = vmatprep.mubr.msk.bf16.mxu0 %vm1158_vm0, %v1157_v1  ;;  %921 = vmatpush3.bf16.msra.mxu0 %v587_v27 }
 0x12b   : > { %v486_v8 = vpop.f32.mrb[0].mxu0 }
 0x12c   : > { %v487_v9 = vadd.f32 %v880_v7, %v486_v8  ;;  %v912_v10 = vpop.f32.mrb[1].mxu0 }
 0x12d   : > { %v489_v11 = vpop.f32.mrb[2].mxu0 }
 0x12e   : > { %v492_v12 = vpack.c.bf16 %v487_v9, %v487_v9  ;;  %v913_v13 = vpop.f32.mrb[3].mxu0 }
 0x130   : > { %494 = vst.msk [vmem:[#allocation2] sm:$0xf] %vm493_vm3, %v492_v12 }
 0x137   : > { %v500_v14 = vld [vmem:[#allocation2] sm:$0xf] }
 0x138   : > { %917 = vmatmul.mubr.msk.bf16.vlgmr.msra.gmra.mrb[0].mxu1 %vm498_vm2, %v500_v14 }
 0x139   : > { %928 = vmatprep.mubr.msk.bf16.mxu1 %vm1158_vm0, %v1157_v1  ;;  %927 = vmatpush3.bf16.msra.mxu1 %v653_v42 }
 0x20b   : > { %v543_v16 = vpop.f32.mrb[0].mxu1 }
 0x20c   : > { %v918_v17 = vpop.f32.mrb[1].mxu1  ;;  %v550_v18 = vsel %vm498_vm2, %v543_v16, -inf }
 0x20d   : > { %551 = vmax.xlane.f32.xlu0 %v550_v18  ;;  %v546_v19 = vpop.f32.mrb[2].mxu1 }
 0x20e   : > { %v919_v20 = vpop.f32.mrb[3].mxu1 }
 0x29a   : > { %v552_v23 = vpop.xlane.xlu0 %551 }
 0x29b   : > { %v553_v24 = vmax.f32 %v549_v22, %v552_v23 }
 0x29d   : > { %v554_v25 = vsub.f32 %v549_v22, %v553_v24  ;;  %631 = vst.msk [vmem:[#allocation3] sm:$0xff] %vm495_vm4, %v553_v24  ;;  %559 = vperm.xlu0 %1015, %v553_v24  }
 0x29f   : > { %v555_v34 = vmul.f32 1.442695, %v554_v25 }
 0x31c   : > { %v560_v28 = vpop.permute.xlu0 %559 }
 0x31d   : > { %v562_v29 = vsub.f32 %v543_v16, %v560_v28 }
 0x31f   : > { %v563_v30 = vmul.f32 1.442695, %v562_v29 }
 0x321   : > { %1019 = vpow2.f32 %v563_v30 }
 0x322   : > { %1021 = vpow2.f32 %v555_v34 }
 0x32b   : > { %v1020_v31 = vpop.eup %1019 }
 0x32c   : > { %v567_v32 = vsel %vm498_vm2, %v1020_v31, 0.0  ;;  %v580_v33 = vpack.c.bf16 %v1020_v31, %v1020_v31  ;;  %v1022_v35 = vpop.eup %1021 }
 0x32d   : > { %568 = vadd.xlane.f32.xlu1 %v567_v32  ;;  %v566_v37 = vmul.f32 %v1022_v35, %v565_v36 }
 0x32e   : > { %923 = vmatmul.mubr.msk.bf16.vlgmr.msra.gmra.mrb[4].mxu0 %vm498_vm2, %v580_v33 }
 0x33e   : > { %576 = vperm.xlu1 %1016, %v1022_v35  }
 0x3ba   : > { %v569_v38 = vpop.xlane.xlu1 %568 }
 0x3bb   : > { %v570_v39 = vadd.f32 %v569_v38, %v566_v37 }
 0x3bd   : > { %572 = vst.msk [vmem:[#allocation4] sm:$0xff] %vm495_vm4, %v570_v39 }
 0x3be   : > { %v577_v44 = vpop.permute.xlu1 %576 }
 0x3bf   : > { %v579_v45 = vmul.f32 %v577_v44, %v573_v43 }
 0x3c4   : > { %v636_v40 = vld [vmem:[#allocation4] sm:$0xff] }
 0x3c5   : > { %639 = vperm.xlu1 %1016, %v636_v40  }
 0x401   : > { %v623_v46 = vpop.f32.mrb[4].mxu0 }
 0x402   : > { %v629_v47 = vadd.f32 %v623_v46, %v579_v45  ;;  %v924_v48 = vpop.f32.mrb[5].mxu0 }
 0x403   : > { %v626_v49 = vpop.f32.mrb[6].mxu0 }
 0x404   : > { %630 = vst.msk [vmem:[#allocation5] sm:$0xff] %vm498_vm2, %v629_v47  ;;  %v925_v50 = vpop.f32.mrb[7].mxu0 }
 0x40b   : > { %v635_v53 = vld [vmem:[#allocation5] sm:$0xff] }
 0x444   : > { %v640_v51 = vpop.permute.xlu1 %639 }
 0x445   : > { %1023 = vrcp.f32 %v640_v51 }
 0x44f   : > { %v1024_v52 = vpop.eup %1023 }
 0x450   : > { %v643_v54 = vmul.f32 %v1024_v52, %v635_v53 }
 0x452   : > { %v645_v55 = vpack.c.bf16 %v643_v54, %v643_v54 }
 0x454   : > { %929 = vmatmul.mubr.msk.bf16.vlgmr.msra.gmra.mrb[4].mxu1 %vm498_vm2, %v645_v55 }
 0x524   : > { %701 = sbr.rel (!%p697_p9) target bundleno = 1335 (0x537), region = 68 }
 0x527   : > { %v689_v57 = vpop.f32.mrb[4].mxu1 }
 0x528   : > { %v695_v58 = vadd.f32 %v689_v57, %v644_v56  ;;  %v930_v59 = vpop.f32.mrb[5].mxu1 }
 0x529   : > { %v692_v60 = vpop.f32.mrb[6].mxu1 }
 0x52a   : > { %696 = vst [vmem:[#allocation6] sm:$0xff] %v695_v58  ;;  %v931_v61 = vpop.f32.mrb[7].mxu1 }
 0x531   : > { %v702_v62 = vld [vmem:[#allocation6] sm:$0xff] }
 0x532   : > { %v710_v0 = vadd.f32 %v889_v63, %v702_v62 }
 0x534   : > { %v711_v1 = vpack.c.bf16 %v710_v0, %v710_v0 }
 0x536   : > { %712 = vst [vmem:[%s1349_s29] sm:$0xf] %v711_v1 }
 0x537 PF: > { %s891_s27 = sshll.u32 %s1141_s28, 6  ;;  %s728_s13 = sshll.u32 %s1349_s29, 4  ;;  %s729_s13 = int_to_ptr.vmem [resolvable:$true] %s728_s13 }
 0x538   : > { %s1392_s17 = scalar_lea.hbm %s1448_s7, %s891_s27  ;;  %s714_s30 = scalar_lea.sflag [#allocation9], %s1326_s22 }
 0x539   : > { %s1055_s14 = scalar_lea.vmem %s729_s13, 64  ;;  %p1466_p13 = scmp.ne.s32.totalorder %s1460_s16, 0 }
 0x53a   : > { %p1056_p7 = scmp.ne.s32.totalorder %s729_s13, %s1055_s14  ;;  %s1161_s12 = smov [#allocation10]  }
 0x53b   : > { %s1059_s0 = sshll.u32 %s1161_s12, 4  ;;  %s1060_s0 = int_to_ptr.vmem [resolvable:$false] %s1059_s0 }
 0x53c   : > { %p1057_p4 = pnand %p1056_p7, %p1466_p13  ;;  %s1061_s19 = scalar_lea.vmem %s1060_s0, 128 }
 0x53d   : > { %p1062_p3 = scmp.lt.s32.totalorder %s729_s13, %s1060_s0  ;;  %p1063_p8 = scmp.lt.s32.totalorder %s1061_s19, %s1055_s14 }
 0x53e   : > { %p1058_p6 = pneg %p1057_p4 }
 0x53f   : > { %p1064_p12 = por %p1063_p8, %p1062_p3 }
 0x541   : > { %p1065_p1 = pnand %p1064_p12, %p1058_p6 }
 0x543   : > { %1068 = shalt.err (!%p1065_p1)
}
 0x544   : > { %s1069_s28 = scalar_lea.hbm %s1392_s17, 64  ;;  %s1073_s21 = scalar_lea.hbm %s1448_s7, 128 }
 0x545   : > { %p1070_p2 = scmp.ne.s32.totalorder %s1392_s17, %s1069_s28  ;;  %p1074_p11 = scmp.lt.u32.totalorder %s1392_s17, %s1448_s7 }
 0x546   : > { %p1075_p0 = scmp.lt.u32.totalorder %s1073_s21, %s1069_s28  ;;  %p1077_p7 = scmp.lt.u32.totalorder %s1069_s28, %s1392_s17 }
 0x547   : > { %p1071_p5 = pnand %p1070_p2, %p1466_p13 }
 0x548   : > { %p1076_p9 = por %p1075_p0, %p1074_p11 }
 0x549   : > { %p1072_p10 = pneg %p1071_p5 }
 0x54a   : > { %p1078_p4 = por %p1077_p7, %p1076_p9 }
 0x54c   : > { %p1079_p6 = pnand %p1078_p4, %p1072_p10 }
 0x54e   : > { %1082 = shalt.err (!%p1079_p6)
}
 0x54f   : > { %934 = dma.vmem_to_hbm [thread:$0]  (%p1466_p13), %s729_s13, 64, %s1392_s17, %s714_s30  }
 0x550 PF: > { %p945_p3 = scmp.ge.s32.totalorder %s1153_s8, 2  ;;  %s740_s9 = sand.u32 1, %s1125_s24  }
 0x551   : > { %p1467_p8 = scmp.ne.s32.totalorder %s1461_s18, 0  ;;  %s741_s27 = scalar_lea.sflag [#allocation9], %s740_s9 }
 0x553   : > { %p941_p12 = pnand %p945_p3, %p1467_p8 }
 0x555   : > { %1120 = dma.done.wait (!%p941_p12), %s741_s27, 64  }
 0x556   : > { %1122 = vsyncadd (!%p941_p12), %s741_s27, 4294967232  ;;  %s23_s8 = sadd.s32 1, %s1153_s8   ;;  %s1468_s27 = sld [smem:[#allocation13_spill]] }
 0x557   : > { %p20_p1 = scmp.ge.s32.totalorder %s23_s8, 10   ;;  %s1469_s28 = sld [smem:[#allocation14_spill]] }
 0x558   : > { %s1470_s29 = sld [smem:[#allocation15_spill]]  ;;  %s1471_s30 = sld [smem:[#allocation16_spill]] }
 0x559   : > { %s1472_s24 = smov %s1129_s25  ;;  %s1473_s25 = smov %s1133_s26 }
 0x55a   : > { %s1474_s26 = smov %s1278_s20  ;;  %22 = sbr.rel (!%p20_p1) target bundleno = 9 (0x9), region = 118 }
 0x561   :  { %746 = vsyncpa [#allocation8], 1 }
 0x562   :  { %748 = vsyncpa [#allocation8 + $0x1], 1 }
 0x563   :  { %749 = vsyncpa [#allocation9], 1 }
 0x564   :  { %751 = vsyncpa [#allocation9 + $0x1], 1 }

</bundles_post_ra>
